<compile_context>
chip_gen: v7x
topology: tpu7x:2x2x1
jax: 0.10.0
libtpu: 0.0.40
codegen_flags: <defaults>
</compile_context>

<pallas_src>
import math
from functools import partial

import jax
import jax.numpy as jnp
from jax.experimental import pallas as pl
from jax.experimental.pallas import tpu as pltpu

N_H = 128     # Encoder1 hidden widths: (n_h*2, n_h) = (256, 128)
LANE = 128    # TPU lane width


def _round_up(x, m):
    return (x + m - 1) // m * m


def _mlp_kernel(x_ref, w1_ref, b1_ref, w2_ref, b2_ref, w3_ref, b3_ref, o_ref):
    # Fused Linear->ReLU->Linear->ReLU->Linear for one batch tile, fully
    # VMEM-resident.  Dropout(p=0.0) is the identity.
    # TODO(synk): training-mode dropout (drop_rate > 0) not implemented.
    x = x_ref[...]
    h = jnp.dot(x.astype(w1_ref.dtype), w1_ref[...],
                preferred_element_type=jnp.float32)
    h = jnp.maximum(h + b1_ref[...].astype(jnp.float32), 0.0)
    h = jnp.dot(h.astype(w2_ref.dtype), w2_ref[...],
                preferred_element_type=jnp.float32)
    h = jnp.maximum(h + b2_ref[...].astype(jnp.float32), 0.0)
    o = jnp.dot(h.astype(w3_ref.dtype), w3_ref[...],
                preferred_element_type=jnp.float32)
    o_ref[...] = (o + b3_ref[...].astype(jnp.float32)).astype(o_ref.dtype)


@partial(jax.jit, static_argnames=("block_m",))
def encoder1_forward(x, params, block_m=1024):
    """x: (B, in_dim).  params: (w1,b1,w2,b2,w3,b3) in MXU layout
    (weights (fan_in, fan_out), biases (1, fan_out)); the last layer's
    fan_out may be lane-padded at load time.  Returns (B, out_pad)."""
    w1, b1, w2, b2, w3, b3 = params
    B, in_dim = x.shape
    h1 = w1.shape[1]           # 256
    h2 = w2.shape[1]           # 128
    out_pad = w3.shape[1]      # out_dim (lane-padded at load time)

    # Batch tile: multiple of 8 sublanes, capped at block_m.  For B >= 16,
    # also cap at ceil(B/2) so the grid has >= 2 steps and "parallel" can
    # shard work across both v7x TensorCores.
    if B >= 16:
        tm = min(block_m, _round_up((B + 1) // 2, 8))
    else:
        tm = min(block_m, _round_up(B, 8))
    grid = (pl.cdiv(B, tm),)   # ragged last block is masked by Pallas

    # VMEM footprint estimate -> explicit scoped-VMEM limit (v5e default is
    # only 16 MiB); capped at 64 MiB (v7x physical VMEM).
    xb = x.dtype.itemsize
    w_bytes = sum(int(p.size) * p.dtype.itemsize for p in params)
    vmem_est = (2 * tm * in_dim * xb          # double-buffered x tile
                + 2 * tm * out_pad * xb       # double-buffered out tile
                + tm * (h1 + h2) * 4          # f32 intermediates
                + 2 * w_bytes)                # resident weights/biases
    vmem_limit = int(min(64 << 20, max(32 << 20, 2 * vmem_est)))

    cost = pl.CostEstimate(
        flops=2 * B * (in_dim * h1 + h1 * h2 + h2 * out_pad),
        transcendentals=0,
        bytes_accessed=B * (in_dim + out_pad) * xb + w_bytes,
    )

    return pl.pallas_call(
        _mlp_kernel,
        out_shape=jax.ShapeDtypeStruct((B, out_pad), x.dtype),
        grid=grid,
        in_specs=[
            pl.BlockSpec((tm, in_dim), lambda i: (i, 0)),     # x tile (pipelined)
            pl.BlockSpec((in_dim, h1), lambda i: (0, 0)),     # weights / biases
            pl.BlockSpec((1, h1), lambda i: (0, 0)),          # stay VMEM-resident
            pl.BlockSpec((h1, h2), lambda i: (0, 0)),         # across the grid
            pl.BlockSpec((1, h2), lambda i: (0, 0)),
            pl.BlockSpec((h2, out_pad), lambda i: (0, 0)),
            pl.BlockSpec((1, out_pad), lambda i: (0, 0)),
        ],
        out_specs=pl.BlockSpec((tm, out_pad), lambda i: (i, 0)),
        compiler_params=pltpu.CompilerParams(
            dimension_semantics=("parallel",),
            vmem_limit_bytes=vmem_limit),
        cost_estimate=cost,
    )(x, w1, b1, w2, b2, w3, b3)


def init_encoder1_params(key, in_dim, out_dim, weight_dtype=jnp.float32,
                         pad_out_to_lanes=True):
    """PyTorch nn.Linear default init (U(+/-1/sqrt(fan_in))), stored directly
    in MXU layout (W: (fan_in, fan_out), b: (1, fan_out)).  The final layer's
    fan_out is zero-padded to a multiple of 128 lanes so output stores are
    lane-dense; biases stay f32 (accumulate path is f32)."""
    dims = [(in_dim, N_H * 2), (N_H * 2, N_H), (N_H, out_dim)]
    keys = jax.random.split(key, 2 * len(dims))
    params = []
    for i, (fi, fo) in enumerate(dims):
        lim = 1.0 / math.sqrt(fi)
        w = jax.random.uniform(keys[2 * i], (fi, fo), jnp.float32, -lim, lim)
        b = jax.random.uniform(keys[2 * i + 1], (1, fo), jnp.float32, -lim, lim)
        if i == len(dims) - 1 and pad_out_to_lanes:
            fo_pad = _round_up(fo, LANE)
            w = jnp.pad(w, ((0, 0), (0, fo_pad - fo)))
            b = jnp.pad(b, ((0, 0), (0, fo_pad - fo)))
        params += [w.astype(weight_dtype), b]
    return tuple(params)


def params_from_torch_layout(torch_params, weight_dtype=jnp.float32,
                             pad_out_to_lanes=True):
    """One-time conversion from PyTorch layout [(W(out,in), b(out,)), ...x3]
    to MXU layout + lane padding of the last layer.  Never call per forward."""
    out = []
    n = len(torch_params)
    for i, (w, b) in enumerate(torch_params):
        w = jnp.asarray(w).T.astype(jnp.float32)
        b = jnp.asarray(b).reshape(1, -1).astype(jnp.float32)
        if i == n - 1 and pad_out_to_lanes:
            fo = w.shape[1]
            fo_pad = _round_up(fo, LANE)
            w = jnp.pad(w, ((0, 0), (0, fo_pad - fo)))
            b = jnp.pad(b, ((0, 0), (0, fo_pad - fo)))
        out += [w.astype(weight_dtype), b]
    return tuple(out)


def _reference(x, params, out_dim):
    w1, b1, w2, b2, w3, b3 = [jnp.asarray(p, jnp.float32) for p in params]
    h = jnp.maximum(x.astype(jnp.float32) @ w1 + b1, 0.0)
    h = jnp.maximum(h @ w2 + b2, 0.0)
    return (h @ w3 + b3)[:, :out_dim]


if __name__ == "__main__":
    key = jax.random.PRNGKey(0)
    k_x, k_p, k_x2 = jax.random.split(key, 3)

    in_dim, out_dim = 32, 64
    out_pad = _round_up(out_dim, LANE)

    # --- f32 path: exact vs. reference -----------------------------------
    params = init_encoder1_params(k_p, in_dim, out_dim)
    B = 8
    x = jax.random.normal(k_x, (B, in_dim), dtype=jnp.float32)
    out = jax.block_until_ready(encoder1_forward(x, params))
    ref = _reference(x, params, out_dim)
    assert out.shape == (B, out_pad)
    assert jnp.allclose(out[:, :out_dim], ref, atol=1e-5, rtol=1e-5)
    assert jnp.allclose(out[:, out_dim:], 0.0)

    # --- ragged batch (B not a multiple of the tile, grid of 2 steps) -----
    B2 = 20
    x2 = jax.random.normal(k_x2, (B2, in_dim), dtype=jnp.float32)
    out2 = jax.block_until_ready(encoder1_forward(x2, params))
    ref2 = _reference(x2, params, out_dim)
    assert out2.shape == (B2, out_pad)
    assert jnp.allclose(out2[:, :out_dim], ref2, atol=1e-5, rtol=1e-5)

    # --- bf16 operands (v6e/v7x MXU-native), f32 accumulate ---------------
    params_bf16 = init_encoder1_params(k_p, in_dim, out_dim,
                                       weight_dtype=jnp.bfloat16)
    out_bf = jax.block_until_ready(
        encoder1_forward(x.astype(jnp.bfloat16), params_bf16))
    assert out_bf.shape == (B, out_pad)
    assert jnp.allclose(out_bf[:, :out_dim].astype(jnp.float32), ref,
                        atol=1e-1, rtol=1e-1)

    print("KERNEL_OK")
</pallas_src>

<mosaic_0001>
module attributes {stable_mosaic.version = 11 : i64} {
  func.func @_mlp_kernel(%arg0: i32, %arg1: memref<8x32xf32, #tpu.memory_space<vmem>>, %arg2: memref<32x256xf32, #tpu.memory_space<vmem>>, %arg3: memref<1x256xf32, #tpu.memory_space<vmem>>, %arg4: memref<256x128xf32, #tpu.memory_space<vmem>>, %arg5: memref<1x128xf32, #tpu.memory_space<vmem>>, %arg6: memref<128x128xf32, #tpu.memory_space<vmem>>, %arg7: memref<1x128xf32, #tpu.memory_space<vmem>>, %arg8: memref<8x128xf32, #tpu.memory_space<vmem>>) attributes {dimension_semantics = [#tpu.dimension_semantics<parallel>], iteration_bounds = array<i64: 1>, scalar_prefetch = 0 : i64, scratch_operands = 0 : i64, tpu.core_type = #tpu.core_type<tc>, window_params = [{transform_indices = @transform_0, window_bounds = array<i64: 8, 32>}, {pipeline_mode = #tpu.pipeline_mode<synchronous>, transform_indices = @transform_1, window_bounds = array<i64: 32, 256>}, {pipeline_mode = #tpu.pipeline_mode<synchronous>, transform_indices = @transform_2, window_bounds = array<i64: 1, 256>}, {pipeline_mode = #tpu.pipeline_mode<synchronous>, transform_indices = @transform_3, window_bounds = array<i64: 256, 128>}, {pipeline_mode = #tpu.pipeline_mode<synchronous>, transform_indices = @transform_4, window_bounds = array<i64: 1, 128>}, {pipeline_mode = #tpu.pipeline_mode<synchronous>, transform_indices = @transform_5, window_bounds = array<i64: 128, 128>}, {pipeline_mode = #tpu.pipeline_mode<synchronous>, transform_indices = @transform_6, window_bounds = array<i64: 1, 128>}, {transform_indices = @transform_7, window_bounds = array<i64: 8, 128>}]} {
    %c0 = arith.constant 0 : index
    %c0_0 = arith.constant 0 : index
    %0 = vector.load %arg1[%c0, %c0_0] : memref<8x32xf32, #tpu.memory_space<vmem>>, vector<8x32xf32>
    %c0_1 = arith.constant 0 : index
    %c0_2 = arith.constant 0 : index
    %1 = vector.load %arg2[%c0_1, %c0_2] : memref<32x256xf32, #tpu.memory_space<vmem>>, vector<32x256xf32>
    %cst = arith.constant dense<0.000000e+00> : vector<8x256xf32>
    %2 = tpu.matmul %0, %1, %cst {dimension_numbers = #tpu.dot_dimension_numbers<[1], [0], [0], [1], [0, 0, 1, 1], [], []>} : vector<8x32xf32>, vector<32x256xf32>, vector<8x256xf32> -> vector<8x256xf32>
    %c0_3 = arith.constant 0 : index
    %c0_4 = arith.constant 0 : index
    %3 = vector.load %arg3[%c0_3, %c0_4] : memref<1x256xf32, #tpu.memory_space<vmem>>, vector<1x256xf32>
    %4 = vector.broadcast %3 : vector<1x256xf32> to vector<8x256xf32>
    %5 = arith.addf %2, %4 : vector<8x256xf32>
    %cst_5 = arith.constant 0.000000e+00 : f32
    %6 = vector.broadcast %cst_5 : f32 to vector<8x256xf32>
    %7 = arith.maximumf %5, %6 : vector<8x256xf32>
    %c0_6 = arith.constant 0 : index
    %c0_7 = arith.constant 0 : index
    %8 = vector.load %arg4[%c0_6, %c0_7] : memref<256x128xf32, #tpu.memory_space<vmem>>, vector<256x128xf32>
    %cst_8 = arith.constant dense<0.000000e+00> : vector<8x128xf32>
    %9 = tpu.matmul %7, %8, %cst_8 {dimension_numbers = #tpu.dot_dimension_numbers<[1], [0], [0], [1], [0, 0, 1, 1], [], []>} : vector<8x256xf32>, vector<256x128xf32>, vector<8x128xf32> -> vector<8x128xf32>
    %c0_9 = arith.constant 0 : index
    %c0_10 = arith.constant 0 : index
    %10 = vector.load %arg5[%c0_9, %c0_10] : memref<1x128xf32, #tpu.memory_space<vmem>>, vector<1x128xf32>
    %11 = vector.broadcast %10 : vector<1x128xf32> to vector<8x128xf32>
    %12 = arith.addf %9, %11 : vector<8x128xf32>
    %cst_11 = arith.constant 0.000000e+00 : f32
    %13 = vector.broadcast %cst_11 : f32 to vector<8x128xf32>
    %14 = arith.maximumf %12, %13 : vector<8x128xf32>
    %c0_12 = arith.constant 0 : index
    %c0_13 = arith.constant 0 : index
    %15 = vector.load %arg6[%c0_12, %c0_13] : memref<128x128xf32, #tpu.memory_space<vmem>>, vector<128x128xf32>
    %cst_14 = arith.constant dense<0.000000e+00> : vector<8x128xf32>
    %16 = tpu.matmul %14, %15, %cst_14 {dimension_numbers = #tpu.dot_dimension_numbers<[1], [0], [0], [1], [0, 0, 1, 1], [], []>} : vector<8x128xf32>, vector<128x128xf32>, vector<8x128xf32> -> vector<8x128xf32>
    %c0_15 = arith.constant 0 : index
    %c0_16 = arith.constant 0 : index
    %17 = vector.load %arg7[%c0_15, %c0_16] : memref<1x128xf32, #tpu.memory_space<vmem>>, vector<1x128xf32>
    %18 = vector.broadcast %17 : vector<1x128xf32> to vector<8x128xf32>
    %19 = arith.addf %16, %18 : vector<8x128xf32>
    %c0_17 = arith.constant 0 : index
    %c0_18 = arith.constant 0 : index
    %20 = vector.load %arg8[%c0_17, %c0_18] : memref<8x128xf32, #tpu.memory_space<vmem>>, vector<8x128xf32>
    tpu.vector_store %arg8[%c0_17, %c0_18], %19 {strides = array<i32>} : memref<8x128xf32, #tpu.memory_space<vmem>>, vector<8x128xf32>,
    return
  }
  func.func @transform_0(%arg0: i32) -> (i32, i32) {
    %c0_i32 = arith.constant 0 : i32
    %c0_i32_0 = arith.constant 0 : i32
    return %arg0, %c0_i32 : i32, i32
  }
  func.func @transform_1(%arg0: i32) -> (i32, i32) {
    %c0_i32 = arith.constant 0 : i32
    %c0_i32_0 = arith.constant 0 : i32
    %c0_i32_1 = arith.constant 0 : i32
    return %c0_i32, %c0_i32_0 : i32, i32
  }
  func.func @transform_2(%arg0: i32) -> (i32, i32) {
    %c0_i32 = arith.constant 0 : i32
    %c0_i32_0 = arith.constant 0 : i32
    %c0_i32_1 = arith.constant 0 : i32
    return %c0_i32, %c0_i32_0 : i32, i32
  }
  func.func @transform_3(%arg0: i32) -> (i32, i32) {
    %c0_i32 = arith.constant 0 : i32
    %c0_i32_0 = arith.constant 0 : i32
    %c0_i32_1 = arith.constant 0 : i32
    return %c0_i32, %c0_i32_0 : i32, i32
  }
  func.func @transform_4(%arg0: i32) -> (i32, i32) {
    %c0_i32 = arith.constant 0 : i32
    %c0_i32_0 = arith.constant 0 : i32
    %c0_i32_1 = arith.constant 0 : i32
    return %c0_i32, %c0_i32_0 : i32, i32
  }
  func.func @transform_5(%arg0: i32) -> (i32, i32) {
    %c0_i32 = arith.constant 0 : i32
    %c0_i32_0 = arith.constant 0 : i32
    %c0_i32_1 = arith.constant 0 : i32
    return %c0_i32, %c0_i32_0 : i32, i32
  }
  func.func @transform_6(%arg0: i32) -> (i32, i32) {
    %c0_i32 = arith.constant 0 : i32
    %c0_i32_0 = arith.constant 0 : i32
    %c0_i32_1 = arith.constant 0 : i32
    return %c0_i32, %c0_i32_0 : i32, i32
  }
  func.func @transform_7(%arg0: i32) -> (i32, i32) {
    %c0_i32 = arith.constant 0 : i32
    %c0_i32_0 = arith.constant 0 : i32
    return %arg0, %c0_i32 : i32, i32
  }
}

</mosaic_0001>

<bundles_post_ra>
// kernel: encoder1_forward.1
= control target key start
LH: loop header
LB: loop body
LE: loop exit
PB: predicated region body
PF: predicated region fallthrough
CT: control target
= control target key end

     0   :  { %12 = vsyncpa [#allocation3], 0  ;;  %s806_s0 = inlined_call_operand.hbm [shape: f32[8,32], index: 0, kind: input, shape index: {}]   ;;  %s807_s1 = inlined_call_operand.hbm [shape: f32[32,256], index: 1, kind: input, shape index: {}]   ;;  %s808_s2 = inlined_call_operand.vmem [shape: f32[1,256], index: 2, kind: input, shape index: {}]   ;;  %s809_s3 = inlined_call_operand.hbm [shape: f32[256,128], index: 3, kind: input, shape index: {}]   ;;  %s810_s4 = inlined_call_operand.vmem [shape: f32[1,128], index: 4, kind: input, shape index: {}]   ;;  %s811_s5 = inlined_call_operand.hbm [shape: f32[128,128], index: 5, kind: input, shape index: {}]   ;;  %s812_s6 = inlined_call_operand.vmem [shape: f32[1,128], index: 6, kind: input, shape index: {}]   ;;  %s813_s7 = inlined_call_operand.hbm [shape: f32[8,128], index: 7, kind: output, shape index: {}]  }
   0x1   :  { %13 = vsyncpa [#allocation6], 0 }
   0x2   :  { %14 = vsyncpa [#allocation9], 0 }
   0x3   :  { %15 = vsyncpa [#allocation4], 0  ;;  %s683_s24 = smov [#allocation5]   ;;  %s565_s28 = scalar_lea.hbm %s807_s1, 1024 }
   0x4   :  { %s31_s25 = sshll.u32 %s683_s24, 4  ;;  %p566_p0 = scmp.ne.s32.totalorder %s807_s1, %s565_s28  ;;  %s32_s25 = int_to_ptr.vmem [resolvable:$true] %s31_s25 }
   0x5   :  { %p569_p1 = scmp.lt.u32.totalorder %s565_s28, %s807_s1 }
   0x7   :  { %p571_p2 = pnand %p569_p1, %p566_p0 }
   0x9   :  { %574 = shalt.err (!%p571_p2)
}
   0xa   :  { %s575_s10 = scalar_lea.vmem %s32_s25, 1024  ;;  %p580_p4 = scmp.lt.s32.totalorder %s32_s25, %s32_s25 }
   0xb   :  { %p576_p3 = scmp.ne.s32.totalorder %s32_s25, %s575_s10  ;;  %p581_p5 = scmp.lt.s32.totalorder %s575_s10, %s575_s10 }
   0xd   :  { %p582_p6 = por %p581_p5, %p580_p4 }
   0xf   :  { %p583_p7 = pnand %p582_p6, %p576_p3 }
  0x11   :  { %586 = shalt.err (!%p583_p7)
}
  0x12   :  { %s684_s11 = smov 256   ;;  %s685_s12 = smov 16  }
  0x13   :  { %37 = dma.hbm_to_vmem [thread:$0]  %s807_s1, 1024, %s32_s25, [#allocation6], %s684_s11, %s684_s11, %s685_s12  }
  0x14   :  { %s686_s15 = smov [#allocation2]   ;;  %s687_s17 = smov [#allocation7]  }
  0x15   :  { %s22_s16 = sshll.u32 %s686_s15, 4  ;;  %s45_s18 = sshll.u32 %s687_s17, 4  ;;  %s23_s16 = int_to_ptr.vmem [resolvable:$true] %s22_s16  ;;  %s46_s18 = int_to_ptr.vmem [resolvable:$true] %s45_s18 }
  0x16   :  { %s587_s21 = scalar_lea.hbm %s806_s0, 128 }
  0x17   :  { %p588_p8 = scmp.ne.s32.totalorder %s806_s0, %s587_s21  ;;  %p591_p9 = scmp.lt.u32.totalorder %s587_s21, %s806_s0 }
  0x19   :  { %p593_p10 = pnand %p591_p9, %p588_p8 }
  0x1b   :  { %596 = shalt.err (!%p593_p10)
}
  0x1c   :  { %s597_s1 = scalar_lea.vmem %s23_s16, 128  ;;  %p602_p12 = scmp.lt.s32.totalorder %s23_s16, %s23_s16 }
  0x1d   :  { %p598_p11 = scmp.ne.s32.totalorder %s23_s16, %s597_s1  ;;  %p603_p13 = scmp.lt.s32.totalorder %s597_s1, %s597_s1 }
  0x1f   :  { %p604_p0 = por %p603_p13, %p602_p12 }
  0x21   :  { %p605_p1 = pnand %p604_p0, %p598_p11 }
  0x23   :  { %608 = shalt.err (!%p605_p1)
}
  0x24   :  { %25 = dma.hbm_to_vmem [thread:$0]  %s806_s0, 128, %s23_s16, [#allocation3]  }
  0x25   :  { %s609_s30 = scalar_lea.hbm %s809_s3, 4096 }
  0x26   :  { %p610_p2 = scmp.ne.s32.totalorder %s809_s3, %s609_s30  ;;  %p613_p3 = scmp.lt.u32.totalorder %s609_s30, %s809_s3 }
  0x28   :  { %p615_p4 = pnand %p613_p3, %p610_p2 }
  0x2a   :  { %618 = shalt.err (!%p615_p4)
}
  0x2b   :  { %s619_s12 = scalar_lea.vmem %s46_s18, 4096  ;;  %p624_p6 = scmp.lt.s32.totalorder %s46_s18, %s46_s18 }
  0x2c   :  { %p620_p5 = scmp.ne.s32.totalorder %s46_s18, %s619_s12  ;;  %p625_p7 = scmp.lt.s32.totalorder %s619_s12, %s619_s12 }
  0x2e   :  { %p626_p8 = por %p625_p7, %p624_p6 }
  0x30   :  { %p627_p9 = pnand %p626_p8, %p620_p5 }
  0x32   :  { %630 = shalt.err (!%p627_p9)
}
  0x33   :  { %s688_s0 = smov 128   ;;  %s689_s13 = smov 8  }
  0x34   :  { %51 = dma.hbm_to_vmem [thread:$0]  %s809_s3, 4096, %s46_s18, [#allocation6], %s688_s0, %s688_s0, %s689_s13  }
  0x35   :  { %s690_s16 = smov [#allocation8]   ;;  %s631_s21 = scalar_lea.hbm %s811_s5, 2048 }
  0x36   :  { %s59_s17 = sshll.u32 %s690_s16, 4  ;;  %p632_p10 = scmp.ne.s32.totalorder %s811_s5, %s631_s21  ;;  %s60_s17 = int_to_ptr.vmem [resolvable:$true] %s59_s17 }
  0x37   :  { %p635_p11 = scmp.lt.u32.totalorder %s631_s21, %s811_s5 }
  0x39   :  { %p637_p12 = pnand %p635_p11, %p632_p10 }
  0x3b   :  { %640 = shalt.err (!%p637_p12)
}
  0x3c   :  { %s641_s1 = scalar_lea.vmem %s60_s17, 2048  ;;  %p646_p0 = scmp.lt.s32.totalorder %s60_s17, %s60_s17 }
  0x3d   :  { %p642_p13 = scmp.ne.s32.totalorder %s60_s17, %s641_s1  ;;  %p647_p1 = scmp.lt.s32.totalorder %s641_s1, %s641_s1 }
  0x3f   :  { %p648_p2 = por %p647_p1, %p646_p0 }
  0x41   :  { %p649_p3 = pnand %p648_p2, %p642_p13 }
  0x43   :  { %652 = shalt.err (!%p649_p3)
}
  0x44   :  { %65 = dma.hbm_to_vmem [thread:$0]  %s811_s5, 2048, %s60_s17, [#allocation9], %s688_s0, %s688_s0, %s689_s13  }
  0x45   :  { %675 = dma.done.wait [#allocation3], 128  }
  0x46   :  { %676 = vsyncadd [#allocation3], 4294967168 }
  0x47   :  { %677 = dma.done.wait [#allocation6], 5120  }
  0x48   :  { %678 = vsyncadd [#allocation6], 4294962176 }
  0x49   :  { %679 = dma.done.wait [#allocation9], 2048  }
  0x4a   :  { %680 = vsyncadd [#allocation9], 4294965248  ;;  %v691_v0 = vmov 0.0   ;;  %v82_v1 = vld [vmem:[#allocation5 + $0x8] sm:$0xff]  ;;  %v84_v2 = vld [vmem:[#allocation5 + $0x18] sm:$0xff]  ;;  %vm101_vm0 = vcmask 261120  }
  0x4b   :  { %169 = vmatprep.mubr.f32.mxu0 %v691_v0  ;;  %v81_v3 = vld [vmem:[#allocation5] sm:$0xff]  ;;  %v489_v4 = vpack.c.bf16 %v84_v2, %v82_v1  ;;  %v83_v5 = vld [vmem:[#allocation5 + $0x10] sm:$0xff]  ;;  %v86_v6 = vld [vmem:[#allocation5 + $0x28] sm:$0xff]  ;;  %v692_v2 = vmov 0.0|0.0   ;;  %vm693_vm1 = vmmov 0   ;;  %s694_s30 = smov [#allocation10]  }
  0x4c   :  { %v88_v7 = vld [vmem:[#allocation5 + $0x38] sm:$0xff]  ;;  %v491_v8 = vpack.c.bf16 %v83_v5, %v81_v3  ;;  %v85_v10 = vld [vmem:[#allocation5 + $0x20] sm:$0xff]  ;;  %v87_v11 = vld [vmem:[#allocation5 + $0x30] sm:$0xff]  ;;  %s388_s8 = sshll.u32 %s694_s30, 4  ;;  %s389_s8 = int_to_ptr.vmem [resolvable:$true] %s388_s8 }
  0x4d   :  { %v493_v9 = vpack.c.bf16 %v88_v7, %v86_v6  ;;  %490 = vmatprep.subr.bf16.mxu0 %v489_v4  ;;  %v194_v12 = vld [vmem:[#allocation7 + $0x80] sm:$0xff]  ;;  %v195_v13 = vld [vmem:[#allocation7 + $0x88] sm:$0xff]  ;;  %v495_v15 = vpack.c.bf16 %v87_v11, %v85_v10  ;;  %v196_v18 = vld [vmem:[#allocation7 + $0x90] sm:$0xff]  ;;  %s653_s9 = scalar_lea.vmem %s389_s8, 128  ;;  %p658_p5 = scmp.lt.s32.totalorder %s389_s8, %s389_s8 }
  0x4e   :  { %v178_v14 = vld [vmem:[#allocation7] sm:$0xff]  ;;  %492 = vmatpush1.bf16.msra.mxu0 %v491_v8  ;;  %v497_v16 = vpack.c.bf16 %v195_v13, %v194_v12  ;;  %v179_v17 = vld [vmem:[#allocation7 + $0x8] sm:$0xff]  ;;  %v197_v19 = vld [vmem:[#allocation7 + $0x98] sm:$0xff]  ;;  %p654_p4 = scmp.ne.s32.totalorder %s389_s8, %s653_s9  ;;  %p659_p6 = scmp.lt.s32.totalorder %s653_s9, %s653_s9 }
  0x4f   :  { %494 = vmatprep.subr.bf16.mxu0 %v493_v9  ;;  %v499_v20 = vpack.c.bf16 %v179_v17, %v178_v14  ;;  %v501_v21 = vpack.c.bf16 %v197_v19, %v196_v18  ;;  %v180_v22 = vld [vmem:[#allocation7 + $0x10] sm:$0xff]  ;;  %v181_v23 = vld [vmem:[#allocation7 + $0x18] sm:$0xff]  ;;  %v198_v24 = vld [vmem:[#allocation7 + $0xa0] sm:$0xff]  ;;  %v91_v18 = vlaneseq }
  0x50   :  { %498 = vmatprep.subr.bf16.mxu1 %v497_v16  ;;  %v199_v25 = vld [vmem:[#allocation7 + $0xa8] sm:$0xff]  ;;  %v503_v26 = vpack.c.bf16 %v181_v23, %v180_v22  ;;  %v80_v27 = vld [vmem:[#allocation2] sm:$0xff]  ;;  %v182_v29 = vld [vmem:[#allocation7 + $0x20] sm:$0xff]  ;;  %p660_p7 = por %p659_p6, %p658_p5 }
  0x51   :  { %500 = vmatpush3.bf16.msra.mxu1 %v499_v20  ;;  %v505_v28 = vpack.c.bf16 %v199_v25, %v198_v24  ;;  %v183_v30 = vld [vmem:[#allocation7 + $0x28] sm:$0xff]  ;;  %v200_v31 = vld [vmem:[#allocation7 + $0xb0] sm:$0xff]  ;;  %v201_v32 = vld [vmem:[#allocation7 + $0xb8] sm:$0xff]  ;;  %v92_v19 = vshrl.u32 %v91_v18, 7 }
  0x52   :  { %496 = vmatpush1.bf16.msra.mxu0 %v495_v15  ;;  %502 = vmatprep.subr.bf16.mxu1 %v501_v21  ;;  %v507_v33 = vpack.c.bf16 %v183_v30, %v182_v29  ;;  %v509_v34 = vpack.c.bf16 %v201_v32, %v200_v31  ;;  %v184_v35 = vld [vmem:[#allocation7 + $0x30] sm:$0xff]  ;;  %v185_v36 = vld [vmem:[#allocation7 + $0x38] sm:$0xff]  ;;  %v202_v37 = vld [vmem:[#allocation7 + $0xc0] sm:$0xff]  ;;  %p661_p8 = pnand %p660_p7, %p654_p4 }
  0x53   :  { %v203_v38 = vld [vmem:[#allocation7 + $0xc8] sm:$0xff]  ;;  %v511_v39 = vpack.c.bf16 %v185_v36, %v184_v35  ;;  %v186_v41 = vld [vmem:[#allocation7 + $0x40] sm:$0xff]  ;;  %v204_v43 = vld [vmem:[#allocation7 + $0xd0] sm:$0xff]  ;;  %529 = vmatprep.subr.bf16.mxu0 %v692_v2  ;;  %v93_v20 = vsub.s32 0, %v92_v19  ;;  %v97_v22 = vsub.s32 1, %v92_v19 }
  0x54   :  { %v513_v40 = vpack.c.bf16 %v203_v38, %v202_v37  ;;  %v187_v42 = vld [vmem:[#allocation7 + $0x48] sm:$0xff]  ;;  %v205_v44 = vld [vmem:[#allocation7 + $0xd8] sm:$0xff]  ;;  %v188_v47 = vld [vmem:[#allocation7 + $0x50] sm:$0xff] }
  0x55   :  { %399 = vmatmul.mubr.msk.f32.vlgmr.msra.gmra.mrb[0].mxu0 %vm101_vm0, %v80_v27  ;;  %504 = vmatpush3.bf16.msra.mxu1 %v503_v26  ;;  %v515_v45 = vpack.c.bf16 %v187_v42, %v186_v41  ;;  %v517_v46 = vpack.c.bf16 %v205_v44, %v204_v43  ;;  %v189_v48 = vld [vmem:[#allocation7 + $0x58] sm:$0xff]  ;;  %v206_v49 = vld [vmem:[#allocation7 + $0xe0] sm:$0xff]  ;;  %v207_v50 = vld [vmem:[#allocation7 + $0xe8] sm:$0xff] }
  0x56   :  { %506 = vmatprep.subr.bf16.mxu1 %v505_v28  ;;  %v519_v51 = vpack.c.bf16 %v189_v48, %v188_v47  ;;  %v521_v52 = vpack.c.bf16 %v207_v50, %v206_v49  ;;  %v190_v53 = vld [vmem:[#allocation7 + $0x60] sm:$0xff]  ;;  %v191_v54 = vld [vmem:[#allocation7 + $0x68] sm:$0xff]  ;;  %v208_v56 = vld [vmem:[#allocation7 + $0xf0] sm:$0xff]  ;;  %486 = vmatprep.mubr.msk.f32.mxu0 %vm693_vm1, %v691_v0 }
  0x57   :  { %v523_v55 = vpack.c.bf16 %v191_v54, %v190_v53  ;;  %v209_v57 = vld [vmem:[#allocation7 + $0xf8] sm:$0xff]  ;;  %v192_v59 = vld [vmem:[#allocation7 + $0x70] sm:$0xff]  ;;  %v288_v62 = vld [vmem:[#allocation8] sm:$0xff] }
  0x58   :  { %v525_v58 = vpack.c.bf16 %v209_v57, %v208_v56  ;;  %v193_v60 = vld [vmem:[#allocation7 + $0x78] sm:$0xff]  ;;  %v289_v63 = vld [vmem:[#allocation8 + $0x8] sm:$0xff]  ;;  %v290_v1 = vld [vmem:[#allocation8 + $0x10] sm:$0xff] }
  0x59   :  { %508 = vmatpush3.bf16.msra.mxu1 %v507_v33  ;;  %v527_v61 = vpack.c.bf16 %v193_v60, %v192_v59  ;;  %v530_v3 = vpack.c.bf16 %v289_v63, %v288_v62  ;;  %v291_v4 = vld [vmem:[#allocation8 + $0x18] sm:$0xff]  ;;  %v292_v6 = vld [vmem:[#allocation8 + $0x20] sm:$0xff]  ;;  %v293_v7 = vld [vmem:[#allocation8 + $0x28] sm:$0xff] }
  0x5a   :  { %510 = vmatprep.subr.bf16.mxu1 %v509_v34  ;;  %v533_v5 = vpack.c.bf16 %v291_v4, %v290_v1  ;;  %v536_v8 = vpack.c.bf16 %v293_v7, %v292_v6  ;;  %v294_v9 = vld [vmem:[#allocation8 + $0x30] sm:$0xff]  ;;  %v295_v10 = vld [vmem:[#allocation8 + $0x38] sm:$0xff]  ;;  %v296_v12 = vld [vmem:[#allocation8 + $0x40] sm:$0xff] }
  0x5b   :  { %531 = vmatpush3.bf16.msra.mxu0 %v530_v3  ;;  %v539_v11 = vpack.c.bf16 %v295_v10, %v294_v9  ;;  %v297_v13 = vld [vmem:[#allocation8 + $0x48] sm:$0xff]  ;;  %v298_v15 = vld [vmem:[#allocation8 + $0x50] sm:$0xff]  ;;  %v299_v16 = vld [vmem:[#allocation8 + $0x58] sm:$0xff] }
  0x5c   :  { %532 = vmatprep.subr.bf16.mxu0 %v692_v2  ;;  %v542_v14 = vpack.c.bf16 %v297_v13, %v296_v12  ;;  %v545_v17 = vpack.c.bf16 %v299_v16, %v298_v15  ;;  %v89_v21 = vld [vmem:[%s808_s2] sm:$0x3]  ;;  %v300_v31 = vld [vmem:[#allocation8 + $0x60] sm:$0xff]  ;;  %v301_v32 = vld [vmem:[#allocation8 + $0x68] sm:$0xff] }
  0x5d   :  { %512 = vmatpush3.bf16.msra.mxu1 %v511_v39  ;;  %v94_v23 = vrot.slane %v89_v21, %v93_v20  ;;  %v98_v24 = vrot.slane %v89_v21, %v97_v22  ;;  %v548_v33 = vpack.c.bf16 %v301_v32, %v300_v31  ;;  %v302_v34 = vld [vmem:[#allocation8 + $0x70] sm:$0xff]  ;;  %v303_v35 = vld [vmem:[#allocation8 + $0x78] sm:$0xff] }
  0x5e   :  { %514 = vmatprep.subr.bf16.mxu1 %v513_v40  ;;  %v551_v36 = vpack.c.bf16 %v303_v35, %v302_v34  ;;  %v400_v38 = vld [vmem:[%s810_s4] ss:$0 sm:$0xff] }
  0x5f   :  { %534 = vmatpush3.bf16.msra.mxu0 %v533_v5  ;;  %v401_v43 = vld [vmem:[%s812_s6] ss:$0 sm:$0xff] }
  0x60   :  { %535 = vmatprep.subr.bf16.mxu0 %v692_v2 }
  0x61   :  { %516 = vmatpush3.bf16.msra.mxu1 %v515_v45 }
  0x62   :  { %518 = vmatprep.subr.bf16.mxu1 %v517_v46 }
  0x63   :  { %537 = vmatpush3.bf16.msra.mxu0 %v536_v8 }
  0x64   :  { %538 = vmatprep.subr.bf16.mxu0 %v692_v2 }
  0x65   :  { %520 = vmatpush3.bf16.msra.mxu1 %v519_v51 }
  0x66   :  { %522 = vmatprep.subr.bf16.mxu1 %v521_v52 }
  0x67   :  { %540 = vmatpush3.bf16.msra.mxu0 %v539_v11 }
  0x68   :  { %541 = vmatprep.subr.bf16.mxu0 %v692_v2 }
  0x69   :  { %524 = vmatpush3.bf16.msra.mxu1 %v523_v55 }
  0x6a   :  { %526 = vmatprep.subr.bf16.mxu1 %v525_v58 }
  0x6b   :  { %543 = vmatpush3.bf16.msra.mxu0 %v542_v14 }
  0x6c   :  { %544 = vmatprep.subr.bf16.mxu0 %v692_v2 }
  0x6d   :  { %528 = vmatpush3.bf16.msra.mxu1 %v527_v61 }
  0x6f   :  { %546 = vmatpush3.bf16.msra.mxu0 %v545_v17 }
  0x70   :  { %547 = vmatprep.subr.bf16.mxu0 %v692_v2 }
  0x73   :  { %549 = vmatpush3.bf16.msra.mxu0 %v548_v33 }
  0x74   :  { %550 = vmatprep.subr.bf16.mxu0 %v692_v2 }
  0x77   :  { %552 = vmatpush3.bf16.msra.mxu0 %v551_v36 }
 0x128   :  { %v171_v25 = vpop.f32.mrb[0].mxu0 }
 0x129   :  { %v172_v26 = vadd.f32 %v171_v25, %v94_v23  ;;  %v173_v27 = vpop.f32.mrb[1].mxu0 }
 0x12a   :  { %v174_v28 = vadd.f32 %v173_v27, %v98_v24 }
 0x12b   :  { %v176_v30 = vmax.f32 %v172_v26, 0.0 }
 0x12c   :  { %v177_v29 = vmax.f32 %v174_v28, 0.0 }
 0x12e   :  { %281 = vmatprep.mubr.f32.mxu1 %v177_v29 }
 0x12f   :  { %282 = vmatmul.mubr.f32.vlgmr.msra.gmra.mrb[0].mxu1 %v176_v30 }
 0x202   :  { %v434_v37 = vpop.f32.mrb[0].mxu1 }
 0x203   :  { %v435_v39 = vpop.f32.mrb[1].mxu1 }
 0x204   :  { %v436_v40 = vadd.f32 %v435_v39, %v434_v37 }
 0x206   :  { %v284_v41 = vadd.f32 %v436_v40, %v400_v38 }
 0x208   :  { %v287_v42 = vmax.f32 %v284_v41, 0.0 }
 0x20a   :  { %487 = vmatmul.mubr.f32.vlgmr.msra.gmra.mrb[2].mxu0 %v287_v42 }
 0x2dd   :  { %v377_v44 = vpop.f32.mrb[2].mxu0 }
 0x2de   :  { %v378_v45 = vadd.f32 %v401_v43, %v377_v44  ;;  %v488_v46 = vpop.f32.mrb[3].mxu0 }
 0x2e0   :  { %381 = vst [vmem:[#allocation10] sm:$0xff] %v378_v45 }
 0x2e1   :  { %664 = shalt.err (!%p661_p8)
}
 0x2e2   :  { %s665_s11 = scalar_lea.hbm %s813_s7, 128 }
 0x2e3   :  { %p666_p9 = scmp.ne.s32.totalorder %s813_s7, %s665_s11  ;;  %p669_p10 = scmp.lt.u32.totalorder %s665_s11, %s813_s7 }
 0x2e5   :  { %p671_p11 = pnand %p669_p10, %p666_p9 }
 0x2e7   :  { %674 = shalt.err (!%p671_p11)
}
 0x2e8   :  { %391 = dma.vmem_to_hbm [thread:$0]  %s389_s8, 128, %s813_s7, [#allocation4]  }
 0x2e9   :  { %681 = dma.done.wait [#allocation4], 128  }
 0x2ea   :  { %682 = vsyncadd [#allocation4], 4294967168 }
 0x2eb   :  { %395 = vsyncpa [#allocation3], 1 }
 0x2ec   :  { %396 = vsyncpa [#allocation6], 1 }
 0x2ed   :  { %397 = vsyncpa [#allocation9], 1 }
 0x2ee   :  { %398 = vsyncpa [#allocation4], 1 }

</bundles_post_ra>
